<compile_context>
chip_gen: v7x
topology: tpu7x:2x2x1
jax: 0.10.0
libtpu: 0.0.40
codegen_flags: <defaults>
</compile_context>

<pallas_src>
import math

import jax
import jax.numpy as jnp
from jax.experimental import pallas as pl
from jax.experimental.pallas import tpu as pltpu

NBOXES_PER_PIXEL = 5
NUM_CLASSES = 2


# ----------------------------------------------------------------------------
# Pallas kernel: fused-pass box+class 1x1 predictors for one (batch, HW-tile).
#   w_box_ref : (OB, C)        box-predictor weights, OB = 4*nb
#   w_cls_ref : (OC, C)        class-predictor weights, OC = nc*nb
#   fmap_ref  : (1, C, THW)    NCHW feature-map tile (spatial on lanes)
#   box_ref   : (1, OB, THW)   lane-dense boxes slab tile
#   cls_ref   : (1, OC, THW)   lane-dense classes slab tile
# ----------------------------------------------------------------------------
def predictor_kernel(w_box_ref, w_cls_ref, fmap_ref, box_ref, cls_ref):
    f = fmap_ref[0]  # (C, THW)
    box_ref[0] = jnp.dot(
        w_box_ref[...], f, preferred_element_type=jnp.float32
    ).astype(box_ref.dtype)
    cls_ref[0] = jnp.dot(
        w_cls_ref[...], f, preferred_element_type=jnp.float32
    ).astype(cls_ref.dtype)


def _vmem_capacity_bytes():
    # Trace-time hardware query; fall back to the v7x capacity (the smallest
    # of the three generations) so the budget stays safe everywhere.
    try:
        cap = getattr(pltpu.get_tpu_info(), "vmem_capacity_bytes", None)
        if cap:
            return int(cap)
    except Exception:
        pass
    return 64 * 1024 * 1024


def _pick_hw_tile(HW, B, bytes_per_pos_dbuf, tile_budget_bytes):
    """Largest lane-aligned spatial tile whose double-buffered traffic fits the budget."""
    t_max = max(128, ((tile_budget_bytes // bytes_per_pos_dbuf) // 128) * 128)
    hw_tile = HW if HW <= t_max else t_max
    # v7x megacore: make sure there are >= 2 grid steps to shard across the
    # two TensorCores (harmless no-op on v5e/v6e).
    n_steps = B * pl.cdiv(HW, hw_tile)
    if n_steps < 2 and HW > 128:
        hw_tile = max(128, ((hw_tile // 2) // 128) * 128)
    return hw_tile


def multi_object_predictors(feature_maps_nchw, w_box, w_cls):
    """Fused-pass 1x1 conv box / class predictors (the MultiObjectDetector hot path)."""
    B, C, H, W = feature_maps_nchw.shape
    HW = H * W
    OB = 4 * NBOXES_PER_PIXEL            # 20 box-predictor output channels
    OC = NUM_CLASSES * NBOXES_PER_PIXEL  # 10 class-predictor output channels
    OUT = OB + OC

    # NCHW consumed directly: (B, C, H, W) -> (B, C, HW) is a free bitcast.
    f = feature_maps_nchw.reshape(B, C, HW)
    # PyTorch conv weights are (out_ch, in_ch, 1, 1) -> used as matmul LHS.
    # (If f is bf16 the weights follow; accumulation stays f32 via
    #  preferred_element_type, so drift vs the f32 reference is small.)
    wb = w_box.reshape(OB, C).astype(f.dtype)
    wc = w_cls.reshape(OC, C).astype(f.dtype)
    in_itemsize = jnp.dtype(f.dtype).itemsize

    # VMEM budget for the double-buffered (input tile + both output tiles):
    # min(capacity/2, 48 MiB) -> ~32 MiB on v7x, 48 MiB on v5e/v6e.
    capacity = _vmem_capacity_bytes()
    tile_budget = min(capacity // 2, 48 * 1024 * 1024)
    bytes_per_pos_dbuf = 2 * (in_itemsize * C + 4 * OUT)
    hw_tile = _pick_hw_tile(HW, B, bytes_per_pos_dbuf, tile_budget)
    n_tiles = pl.cdiv(HW, hw_tile)
    grid = (B, n_tiles)

    # vmem_limit: exactly what the tiles + weights need (+ headroom for Mosaic
    # internal scratch); never clamped below 'needed'.
    needed = (bytes_per_pos_dbuf * hw_tile          # double-buffered in+out tiles
              + 2 * in_itemsize * OUT * C           # weights (double-buffered)
              + (2 << 20))                          # headroom
    vmem_limit = int(max(16 * 1024 * 1024, needed))

    boxes_slab, classes_slab = pl.pallas_call(
        predictor_kernel,
        out_shape=(
            jax.ShapeDtypeStruct((B, OB, HW), jnp.float32),
            jax.ShapeDtypeStruct((B, OC, HW), jnp.float32),
        ),
        grid_spec=pltpu.PrefetchScalarGridSpec(
            num_scalar_prefetch=0,
            grid=grid,
            in_specs=[
                pl.BlockSpec((OB, C), lambda b, t: (0, 0)),
                pl.BlockSpec((OC, C), lambda b, t: (0, 0)),
                pl.BlockSpec((1, C, hw_tile), lambda b, t: (b, 0, t)),
            ],
            out_specs=[
                pl.BlockSpec((1, OB, hw_tile), lambda b, t: (b, 0, t)),
                pl.BlockSpec((1, OC, hw_tile), lambda b, t: (b, 0, t)),
            ],
        ),
        compiler_params=pltpu.CompilerParams(
            dimension_semantics=("parallel", "parallel"),
            vmem_limit_bytes=vmem_limit,
        ),
        cost_estimate=pl.CostEstimate(
            flops=2 * B * HW * C * OUT,
            transcendentals=0,
            bytes_accessed=(in_itemsize * B * C * HW
                            + 4 * B * OUT * HW
                            + in_itemsize * OUT * C),
        ),
    )(wb, wc, f)

    # Free metadata reshapes, exactly like the PyTorch module:
    #   boxes   : (B, 4*nb, H, W)  -> (B, 4,  nb, H, W)
    #   classes : (B, nc*nb, H, W) -> (B, nc, nb, H, W)
    boxes = boxes_slab.reshape(B, 4, NBOXES_PER_PIXEL, H, W)
    classes = classes_slab.reshape(B, NUM_CLASSES, NBOXES_PER_PIXEL, H, W)
    return boxes, classes


# ----------------------------------------------------------------------------
# Feature map generator stand-in.
# TODO(synk): ResNetCNN's definition is not provided in the source module; a
# deterministic 2-layer strided-conv + ReLU stand-in is used to produce
# feature maps of the shape the predictors expect.
# ----------------------------------------------------------------------------
def feature_map_generator(x, w1, w2):
    dn = ("NCHW", "OIHW", "NCHW")
    y = jax.lax.conv_general_dilated(x, w1, (2, 2), "SAME", dimension_numbers=dn)
    y = jax.nn.relu(y)
    y = jax.lax.conv_general_dilated(y, w2, (2, 2), "SAME", dimension_numbers=dn)
    y = jax.nn.relu(y)
    return y


def init_params(key, in_ch, feat_ch):
    k1, k2, k3, k4 = jax.random.split(key, 4)
    # Stand-in backbone weights (deterministic).
    w1 = jax.random.normal(k1, (feat_ch // 2, in_ch, 3, 3), jnp.float32) * 0.1
    w2 = jax.random.normal(k2, (feat_ch, feat_ch // 2, 3, 3), jnp.float32) * 0.1
    # Predictor weights, matching the PyTorch lazy init:
    # uniform(-stdv, stdv) with stdv = 1/sqrt(in_channels), shape (out, C, 1, 1).
    stdv = 1.0 / math.sqrt(feat_ch)
    w_box = jax.random.uniform(
        k3, (4 * NBOXES_PER_PIXEL, feat_ch, 1, 1), jnp.float32, -stdv, stdv)
    w_cls = jax.random.uniform(
        k4, (NUM_CLASSES * NBOXES_PER_PIXEL, feat_ch, 1, 1), jnp.float32, -stdv, stdv)
    return w1, w2, w_box, w_cls


def multi_object_detector_forward(x, params):
    """Equivalent of MultiObjectDetector.forward: returns (x, boxes, classes)."""
    w1, w2, w_box, w_cls = params
    feature_maps = feature_map_generator(x, w1, w2)
    boxes, classes = multi_object_predictors(feature_maps, w_box, w_cls)
    return x, boxes, classes


if __name__ == "__main__":
    key = jax.random.PRNGKey(0)
    kx, kp = jax.random.split(key)

    B, IN_CH, S = 2, 4, 16       # input image: (2, 4, 16, 16), NCHW
    FEAT_CH = 32                 # backbone output channels

    x = jax.random.normal(kx, (B, IN_CH, S, S), jnp.float32)
    params = init_params(kp, IN_CH, FEAT_CH)

    x_out, boxes, classes = jax.jit(multi_object_detector_forward)(x, params)
    jax.block_until_ready((x_out, boxes, classes))

    assert x_out.shape == (B, IN_CH, S, S)
    assert boxes.shape == (B, 4, NBOXES_PER_PIXEL, S // 4, S // 4)
    assert classes.shape == (B, NUM_CLASSES, NBOXES_PER_PIXEL, S // 4, S // 4)

    # Reference check: plain-JAX 1x1 convs (bias-free) must match the kernel.
    fm = feature_map_generator(x, params[0], params[1])
    ref_box = jax.lax.conv_general_dilated(
        fm, params[2], (1, 1), "VALID",
        dimension_numbers=("NCHW", "OIHW", "NCHW"))
    ref_cls = jax.lax.conv_general_dilated(
        fm, params[3], (1, 1), "VALID",
        dimension_numbers=("NCHW", "OIHW", "NCHW"))
    ref_boxes = ref_box.reshape(B, 4, NBOXES_PER_PIXEL, S // 4, S // 4)
    ref_classes = ref_cls.reshape(B, NUM_CLASSES, NBOXES_PER_PIXEL, S // 4, S // 4)
    assert jnp.allclose(boxes, ref_boxes, atol=1e-4, rtol=1e-4)
    assert jnp.allclose(classes, ref_classes, atol=1e-4, rtol=1e-4)

    print("KERNEL_OK")
</pallas_src>

<mosaic_0001>
module attributes {stable_mosaic.version = 11 : i64} {
  func.func @predictor_kernel(%arg0: i32, %arg1: i32, %arg2: memref<20x32xf32, #tpu.memory_space<vmem>>, %arg3: memref<10x32xf32, #tpu.memory_space<vmem>>, %arg4: memref<1x32x16xf32, #tpu.memory_space<vmem>>, %arg5: memref<1x20x16xf32, #tpu.memory_space<vmem>>, %arg6: memref<1x10x16xf32, #tpu.memory_space<vmem>>) attributes {dimension_semantics = [#tpu.dimension_semantics<parallel>, #tpu.dimension_semantics<parallel>], iteration_bounds = array<i64: 2, 1>, scalar_prefetch = 0 : i64, scratch_operands = 0 : i64, tpu.core_type = #tpu.core_type<tc>, window_params = [{pipeline_mode = #tpu.pipeline_mode<synchronous>, transform_indices = @transform_0, window_bounds = array<i64: 20, 32>}, {pipeline_mode = #tpu.pipeline_mode<synchronous>, transform_indices = @transform_1, window_bounds = array<i64: 10, 32>}, {transform_indices = @transform_2, window_bounds = array<i64: 1, 32, 16>}, {transform_indices = @transform_3, window_bounds = array<i64: 1, 20, 16>}, {transform_indices = @transform_4, window_bounds = array<i64: 1, 10, 16>}]} {
    %c0 = arith.constant 0 : index
    %c0_0 = arith.constant 0 : index
    %c0_1 = arith.constant 0 : index
    %0 = vector.load %arg4[%c0, %c0_0, %c0_1] : memref<1x32x16xf32, #tpu.memory_space<vmem>>, vector<1x32x16xf32>
    %1 = vector.shape_cast %0 : vector<1x32x16xf32> to vector<32x16xf32>
    %c0_2 = arith.constant 0 : index
    %c0_3 = arith.constant 0 : index
    %2 = vector.load %arg2[%c0_2, %c0_3] : memref<20x32xf32, #tpu.memory_space<vmem>>, vector<20x32xf32>
    %cst = arith.constant dense<0.000000e+00> : vector<20x16xf32>
    %3 = tpu.matmul %2, %1, %cst {dimension_numbers = #tpu.dot_dimension_numbers<[1], [0], [0], [1], [0, 0, 1, 1], [], []>} : vector<20x32xf32>, vector<32x16xf32>, vector<20x16xf32> -> vector<20x16xf32>
    %c0_4 = arith.constant 0 : index
    %c0_5 = arith.constant 0 : index
    %c0_6 = arith.constant 0 : index
    %4 = vector.load %arg5[%c0_4, %c0_5, %c0_6] : memref<1x20x16xf32, #tpu.memory_space<vmem>>, vector<1x20x16xf32>
    %5 = vector.shape_cast %4 : vector<1x20x16xf32> to vector<20x16xf32>
    %6 = vector.shape_cast %3 : vector<20x16xf32> to vector<1x20x16xf32>
    tpu.vector_store %arg5[%c0_4, %c0_5, %c0_6], %6 {strides = array<i32>} : memref<1x20x16xf32, #tpu.memory_space<vmem>>, vector<1x20x16xf32>,
    %c0_7 = arith.constant 0 : index
    %c0_8 = arith.constant 0 : index
    %7 = vector.load %arg3[%c0_7, %c0_8] : memref<10x32xf32, #tpu.memory_space<vmem>>, vector<10x32xf32>
    %cst_9 = arith.constant dense<0.000000e+00> : vector<10x16xf32>
    %8 = tpu.matmul %7, %1, %cst_9 {dimension_numbers = #tpu.dot_dimension_numbers<[1], [0], [0], [1], [0, 0, 1, 1], [], []>} : vector<10x32xf32>, vector<32x16xf32>, vector<10x16xf32> -> vector<10x16xf32>
    %c0_10 = arith.constant 0 : index
    %c0_11 = arith.constant 0 : index
    %c0_12 = arith.constant 0 : index
    %9 = vector.load %arg6[%c0_10, %c0_11, %c0_12] : memref<1x10x16xf32, #tpu.memory_space<vmem>>, vector<1x10x16xf32>
    %10 = vector.shape_cast %9 : vector<1x10x16xf32> to vector<10x16xf32>
    %11 = vector.shape_cast %8 : vector<10x16xf32> to vector<1x10x16xf32>
    tpu.vector_store %arg6[%c0_10, %c0_11, %c0_12], %11 {strides = array<i32>} : memref<1x10x16xf32, #tpu.memory_space<vmem>>, vector<1x10x16xf32>,
    return
  }
  func.func @transform_0(%arg0: i32, %arg1: i32) -> (i32, i32) {
    %c0_i32 = arith.constant 0 : i32
    %c0_i32_0 = arith.constant 0 : i32
    %c0_i32_1 = arith.constant 0 : i32
    return %c0_i32, %c0_i32_0 : i32, i32
  }
  func.func @transform_1(%arg0: i32, %arg1: i32) -> (i32, i32) {
    %c0_i32 = arith.constant 0 : i32
    %c0_i32_0 = arith.constant 0 : i32
    %c0_i32_1 = arith.constant 0 : i32
    return %c0_i32, %c0_i32_0 : i32, i32
  }
  func.func @transform_2(%arg0: i32, %arg1: i32) -> (i32, i32, i32) {
    %c0_i32 = arith.constant 0 : i32
    %c0_i32_0 = arith.constant 0 : i32
    return %arg0, %c0_i32, %arg1 : i32, i32, i32
  }
  func.func @transform_3(%arg0: i32, %arg1: i32) -> (i32, i32, i32) {
    %c0_i32 = arith.constant 0 : i32
    %c0_i32_0 = arith.constant 0 : i32
    return %arg0, %c0_i32, %arg1 : i32, i32, i32
  }
  func.func @transform_4(%arg0: i32, %arg1: i32) -> (i32, i32, i32) {
    %c0_i32 = arith.constant 0 : i32
    %c0_i32_0 = arith.constant 0 : i32
    return %arg0, %c0_i32, %arg1 : i32, i32, i32
  }
}

</mosaic_0001>

<bundles_post_ra>
// kernel: multi_object_detector_forward.1
= control target key start
LH: loop header
LB: loop body
LE: loop exit
PB: predicated region body
PF: predicated region fallthrough
CT: control target
= control target key end

     0   :  { %s722_s15 = smov 0   ;;  %s724_s16 = smov 0   ;;  %s786_s0 = inlined_call_operand.vmem [shape: f32[20,32], index: 0, kind: input, shape index: {}]   ;;  %s787_s1 = inlined_call_operand.vmem [shape: f32[10,32], index: 1, kind: input, shape index: {}]   ;;  %s788_s2 = inlined_call_operand.vmem [shape: f32[2,32,16], index: 2, kind: input, shape index: {}]   ;;  %s789_s3 = inlined_call_operand.vmem [shape: f32[2,20,16], index: 3, kind: output, shape index: {0}]   ;;  %s790_s4 = inlined_call_operand.vmem [shape: f32[2,10,16], index: 4, kind: output, shape index: {1}]  }
   0x1   :  { %s726_s17 = smov 0  }
   0x2 LB: > { %s27_s18 = sadd.s32 1, %s688_s16  ;;  %p572_p0 = scmp.ge.s32.totalorder %s692_s17, 1  ;;  %s692_s17 = sphi %s726_s17, %s15_s17   ;;  %s688_s16 = sphi %s724_s16, %s792_s16   ;;  %s684_s15 = sphi %s722_s15, %s791_s15  }
   0x3   : > { %p29_p1 = scmp.ge.s32.totalorder %s27_s18, 2  ;;  %p186_p2 = scmp.lt.s32.totalorder %s692_s17, 3 }
   0x5   : > { %s794_s18 = smov (%p29_p1, %s27_s18), 0  ;;  %p187_p3 = pnand %p572_p0, %p186_p2 }
   0x6   : > { %p226_p4 = scmp.lt.s32.totalorder (!%p187_p3), %s684_s15, 1  ;;  %v694_v0 = vmov (!%p187_p3), 0.0|0.0   ;;  %vm695_vm0 = vmmov (!%p187_p3), 0   ;;  %v696_v1 = vmov (!%p187_p3), 0.0   ;;  %vm257_vm1 = vcmask (!%p187_p3), 261120   ;;  %v352_v2 = vld [vmem:[%s787_s1] sm:$0xff] (!%p187_p3) }
   0x7   : > { %190 = sbr.rel (%p187_p3) target bundleno = 248 (0xf8), region = 32  ;;  %628 = vmatprep.subr.bf16.mxu0 (!%p187_p3), %v694_v0  ;;  %608 = vmatprep.mubr.msk.f32.mxu0 (!%p187_p3), %vm695_vm0, %v696_v1  ;;  %v254_v9 = vld [vmem:[%s786_s0] sm:$0xff] (!%p187_p3)  ;;  %v353_v10 = vld [vmem:[%s787_s1 + $0x8] sm:$0x3] (!%p187_p3)  ;;  %v256_v12 = vld [vmem:[%s786_s0 + $0x10] sm:$0xf] (!%p187_p3) }
   0x8   : > { %625 = vmatprep.mubr.msk.f32.mxu1 (!%p187_p3), %vm257_vm1, %v352_v2  ;;  %v255_v11 = vld [vmem:[%s786_s0 + $0x8] sm:$0xff] (!%p187_p3)  ;;  %vm347_vm2 = vcmask (!%p187_p3), 130048   ;;  %vm436_vm3 = vcmask (!%p187_p3), 123904   ;;  %vm350_vm4 = vcmask (!%p187_p3), 125952  }
   0xe   : > { %s796_s15 = smov (!%p226_p4, %s684_s15), 1 }
   0xf   : > { %s585_s21 = sshll.u32 %s796_s15, 5  ;;  %s642_s7 = smul.u32 24, %s796_s15 }
  0x10   : > { %s233_s24 = scalar_lea.vmem %s788_s2, %s585_s21  ;;  %s586_s8 = sshll.u32 %s796_s15, 4 }
  0x11   : > { %v250_v3 = vld [vmem:[%s233_s24] sm:$0xff]  ;;  %v251_v4 = vld [vmem:[%s233_s24 + $0x8] sm:$0xff]  ;;  %v252_v5 = vld [vmem:[%s233_s24 + $0x10] sm:$0xff]  ;;  %s241_s11 = scalar_lea.vmem %s789_s3, %s642_s7  ;;  %s249_s14 = scalar_lea.vmem %s790_s4, %s586_s8 }
  0x12   : > { %v629_v6 = vpack.c.bf16 %v251_v4, %v250_v3  ;;  %v253_v7 = vld [vmem:[%s233_s24 + $0x18] sm:$0xff] }
  0x13   : > { %v632_v8 = vpack.c.bf16 %v253_v7, %v252_v5 }
  0x14   : > { %630 = vmatpush3.bf16.msra.mxu0 %v629_v6  ;;  %635 = vmatprep.subr.bf16.mxu1 %v629_v6 }
  0x15   : > { %631 = vmatprep.subr.bf16.mxu0 %v694_v0  ;;  %637 = vmatpush3.bf16.msra.mxu1 %v629_v6 }
  0x16   : > { %639 = vmatprep.subr.bf16.mxu1 %v632_v8 }
  0x18   : > { %633 = vmatpush3.bf16.msra.mxu0 %v632_v8 }
  0x19   : > { %641 = vmatpush3.bf16.msra.mxu1 %v632_v8 }
  0x1b   : > { %609 = vmatmul.mubr.msk.f32.vlgmr.msra.gmra.mrb[0].mxu0 %vm257_vm1, %v254_v9 }
  0x1c   : > { %611 = vmatprep.mubr.msk.f32.mxu0 %vm695_vm0, %v696_v1  ;;  %626 = vmatmul.mubr.msk.f32.vlgmr.msra.gmra.mrb[0].mxu1 %vm257_vm1, %v353_v10 }
  0x1f   : > { %612 = vmatmul.mubr.msk.f32.gmra.mrb[2].mxu0 %vm257_vm1, %v255_v11 }
  0x20   : > { %614 = vmatprep.mubr.msk.f32.mxu0 %vm695_vm0, %v696_v1 }
  0x23   : > { %615 = vmatmul.mubr.msk.f32.gmra.mrb[4].mxu0 %vm257_vm1, %v256_v12 }
  0xee   : > { %v333_v13 = vpop.f32.mrb[0].mxu0 }
  0xef   : > { %348 = vst.msk [vmem:[%s241_s11] sm:$0xff] %vm347_vm2, %v333_v13  ;;  %v610_v14 = vpop.f32.mrb[1].mxu0  ;;  %v627_v15 = vpop.f32.mrb[0].mxu1 }
  0xf0   : > { %437 = vst.msk [vmem:[%s249_s14 + $0x8] sm:$0x3] %vm436_vm3, %v627_v15  ;;  %v426_v16 = vpop.f32.mrb[1].mxu1 }
  0xf1   : > { %435 = vst.msk [vmem:[%s249_s14] sm:$0xff] %vm347_vm2, %v426_v16 }
  0xf2   : > { %v338_v17 = vpop.f32.mrb[2].mxu0 }
  0xf3   : > { %349 = vst.msk [vmem:[%s241_s11 + $0x8] sm:$0xff] %vm347_vm2, %v338_v17  ;;  %v613_v18 = vpop.f32.mrb[3].mxu0 }
  0xf6   : > { %v343_v19 = vpop.f32.mrb[4].mxu0 }
  0xf7   : > { %351 = vst.msk [vmem:[%s241_s11 + $0x10] sm:$0xf] %vm350_vm4, %v343_v19  ;;  %v616_v20 = vpop.f32.mrb[5].mxu0 }
  0xf8 PF: > { %s15_s17 = sadd.s32 1, %s692_s17   ;;  %s791_s15 = smov %s688_s16 }
  0xf9   : > { %p12_p5 = scmp.ge.s32.totalorder %s15_s17, 4   ;;  %s792_s16 = smov %s794_s18 }
  0xfb   :  { %14 = sbr.rel (!%p12_p5) target bundleno = 2 (0x2), region = 74 }

</bundles_post_ra>
